<compile_context>
chip_gen: v5e
topology: v5e:2x2
jax: 0.10.0
libtpu: 0.0.40
codegen_flags: <defaults>
</compile_context>

<pallas_src>
import jax
import jax.numpy as jnp
from jax.experimental import pallas as pl
from jax.experimental.pallas import tpu as pltpu


_VMEM_TILE_BUDGET = 24 * 1024 * 1024   # double-buffered data tiles, headroom under the limit
_VMEM_LIMIT = 32 * 1024 * 1024         # safe scoped-VMEM limit on v5e/v6e/v7x


def _pick_rows(total_rows, x_lanes, o_lanes):
    """Rows per grid step: multi-MiB tiles, multiple of 8, >= 4 steps when possible."""
    lane_pad = lambda n: pl.cdiv(n, 128) * 128                 # VMEM lane padding
    bytes_per_row = 2 * 4 * (lane_pad(x_lanes) + lane_pad(o_lanes))  # dbuf * f32 * (x + out)
    rows = max(8, ((_VMEM_TILE_BUDGET // bytes_per_row) // 8) * 8)
    # Prefer >= 4 grid steps (v7x: each of the two TCs gets >= 2 pipelined steps).
    rows = min(rows, max(8, (pl.cdiv(total_rows, 4) // 8) * 8))
    if rows >= total_rows:
        rows = total_rows                                      # single full-dim block
    return rows


def _ar_packed_kernel(x_ref, w_ref, b_ref, o_ref):
    # x_ref: (R, 128) VMEM   w_ref: (128, P) VMEM   b_ref: (1,) SMEM   o_ref: (R, P)
    x = x_ref[...].astype(jnp.float32)
    y = jnp.dot(x, w_ref[...], preferred_element_type=jnp.float32) + b_ref[0]
    o_ref[...] = y.astype(o_ref.dtype)


def _ar_rowwise_kernel(x_ref, w_ref, b_ref, o_ref):
    # x_ref: (R, W) VMEM   w_ref: (1, W) VMEM   b_ref: (1,) SMEM   o_ref: (R, 1)
    x = x_ref[...].astype(jnp.float32)
    w = w_ref[...].astype(jnp.float32)
    y = jnp.sum(x * w, axis=-1, keepdims=True) + b_ref[0]
    o_ref[...] = y.astype(o_ref.dtype)


def ar_forward(x, weight, bias):
    """x: [B, F, W]; weight: [1, W]; bias: [1] -> [B, F, 1] (dtype of x)."""
    B, F, W = x.shape
    M = B * F
    b1 = bias.reshape(1).astype(jnp.float32)

    if W <= 128 and 128 % W == 0 and M % (128 // W) == 0:
        # ---- packed lane-dense path: no transpose, no pad, no extra HBM pass.
        P = 128 // W
        m_rows = M // P
        x2 = x.reshape(m_rows, 128)                            # free reshape (contiguous)
        # Block-diagonal weight: w_bd[k*W + w, k] = weight[0, w]
        w_bd = jnp.kron(jnp.eye(P, dtype=jnp.float32),
                        weight.reshape(W, 1).astype(jnp.float32))   # (128, P)
        rows = _pick_rows(m_rows, 128, P)
        out = pl.pallas_call(
            _ar_packed_kernel,
            out_shape=jax.ShapeDtypeStruct((m_rows, P), x.dtype),
            grid_spec=pltpu.PrefetchScalarGridSpec(
                num_scalar_prefetch=0,
                grid=(pl.cdiv(m_rows, rows),),
                in_specs=[
                    pl.BlockSpec((rows, 128), lambda i: (i, 0)),       # lane-dense x tile
                    pl.BlockSpec((128, P), lambda i: (0, 0)),          # resident weight
                    pl.BlockSpec(memory_space=pltpu.MemorySpace.SMEM),  # bias scalar
                ],
                out_specs=pl.BlockSpec((rows, P), lambda i: (i, 0)),
            ),
            compiler_params=pltpu.CompilerParams(
                dimension_semantics=("parallel",),
                vmem_limit_bytes=_VMEM_LIMIT,
            ),
        )(x2, w_bd, b1)
        return out.reshape(B, F, 1)

    # ---- generic fallback: contiguous (rows, W) blocks of the row-major slab.
    x2 = x.reshape(M, W)                                       # free reshape (contiguous)
    w_row = weight.reshape(1, W).astype(jnp.float32)
    rows = _pick_rows(M, W, 1)
    out = pl.pallas_call(
        _ar_rowwise_kernel,
        out_shape=jax.ShapeDtypeStruct((M, 1), x.dtype),
        grid_spec=pltpu.PrefetchScalarGridSpec(
            num_scalar_prefetch=0,
            grid=(pl.cdiv(M, rows),),
            in_specs=[
                pl.BlockSpec((rows, W), lambda i: (i, 0)),
                pl.BlockSpec((1, W), lambda i: (0, 0)),
                pl.BlockSpec(memory_space=pltpu.MemorySpace.SMEM),
            ],
            out_specs=pl.BlockSpec((rows, 1), lambda i: (i, 0)),
        ),
        compiler_params=pltpu.CompilerParams(
            dimension_semantics=("parallel",),
            vmem_limit_bytes=_VMEM_LIMIT,
        ),
    )(x2, w_row, b1)
    return out.reshape(B, F, 1)


if __name__ == "__main__":
    window = 8
    batch, n_features = 2, 16

    key = jax.random.PRNGKey(0)
    kx, kw, kb = jax.random.split(key, 3)

    # nn.Linear(window, 1): weight [1, window], bias [1]
    x = jax.random.normal(kx, (batch, n_features, window), dtype=jnp.float32)
    weight = jax.random.normal(kw, (1, window), dtype=jnp.float32) * 0.1
    bias = jax.random.normal(kb, (1,), dtype=jnp.float32) * 0.1

    y = jax.block_until_ready(ar_forward(x, weight, bias))
    y_ref = x @ weight.T + bias                                # [B, F, 1]
    assert y.shape == (batch, n_features, 1), y.shape
    assert jnp.allclose(y, y_ref, atol=1e-5, rtol=1e-5), "packed path mismatch"

    # Also exercise the generic fallback (window that does not pack into 128 lanes).
    window2 = 6
    x_b = jax.random.normal(kx, (batch, 5, window2), dtype=jnp.float32)
    w_b = jax.random.normal(kw, (1, window2), dtype=jnp.float32) * 0.1
    y_b = jax.block_until_ready(ar_forward(x_b, w_b, bias))
    y_b_ref = x_b @ w_b.T + bias
    assert jnp.allclose(y_b, y_b_ref, atol=1e-5, rtol=1e-5), "fallback path mismatch"

    print("KERNEL_OK")
</pallas_src>

<mosaic_0001>
module attributes {stable_mosaic.version = 11 : i64} {
  func.func @_ar_packed_kernel(%arg0: i32, %arg1: memref<2x128xf32, #tpu.memory_space<vmem>>, %arg2: memref<128x16xf32, #tpu.memory_space<vmem>>, %arg3: memref<1xf32, #tpu.memory_space<smem>>, %arg4: memref<2x16xf32, #tpu.memory_space<vmem>>) attributes {dimension_semantics = [#tpu.dimension_semantics<parallel>], iteration_bounds = array<i64: 1>, scalar_prefetch = 0 : i64, scratch_operands = 0 : i64, tpu.core_type = #tpu.core_type<tc>, window_params = [{transform_indices = @transform_0, window_bounds = array<i64: 2, 128>}, {pipeline_mode = #tpu.pipeline_mode<synchronous>, transform_indices = @transform_1, window_bounds = array<i64: 128, 16>}, {transform_indices = @transform_2, window_bounds = array<i64: 1>}, {transform_indices = @transform_3, window_bounds = array<i64: 2, 16>}]} {
    %c0 = arith.constant 0 : index
    %c0_0 = arith.constant 0 : index
    %0 = vector.load %arg1[%c0, %c0_0] : memref<2x128xf32, #tpu.memory_space<vmem>>, vector<2x128xf32>
    %c0_1 = arith.constant 0 : index
    %c0_2 = arith.constant 0 : index
    %1 = vector.load %arg2[%c0_1, %c0_2] : memref<128x16xf32, #tpu.memory_space<vmem>>, vector<128x16xf32>
    %cst = arith.constant dense<0.000000e+00> : vector<2x16xf32>
    %2 = tpu.matmul %0, %1, %cst {dimension_numbers = #tpu.dot_dimension_numbers<[1], [0], [0], [1], [0, 0, 1, 1], [], []>} : vector<2x128xf32>, vector<128x16xf32>, vector<2x16xf32> -> vector<2x16xf32>
    %c0_3 = arith.constant 0 : index
    %3 = memref.load %arg3[%c0_3] : memref<1xf32, #tpu.memory_space<smem>>
    %4 = vector.broadcast %3 : f32 to vector<2x16xf32>
    %5 = arith.addf %2, %4 : vector<2x16xf32>
    %c0_4 = arith.constant 0 : index
    %c0_5 = arith.constant 0 : index
    %6 = vector.load %arg4[%c0_4, %c0_5] : memref<2x16xf32, #tpu.memory_space<vmem>>, vector<2x16xf32>
    tpu.vector_store %arg4[%c0_4, %c0_5], %5 {strides = array<i32>} : memref<2x16xf32, #tpu.memory_space<vmem>>, vector<2x16xf32>,
    return
  }
  func.func @transform_0(%arg0: i32) -> (i32, i32) {
    %c0_i32 = arith.constant 0 : i32
    %c0_i32_0 = arith.constant 0 : i32
    return %arg0, %c0_i32 : i32, i32
  }
  func.func @transform_1(%arg0: i32) -> (i32, i32) {
    %c0_i32 = arith.constant 0 : i32
    %c0_i32_0 = arith.constant 0 : i32
    %c0_i32_1 = arith.constant 0 : i32
    return %c0_i32, %c0_i32_0 : i32, i32
  }
  func.func @transform_2(%arg0: i32) -> i32 {
    %c0_i32 = arith.constant 0 : i32
    %c0_i32_0 = arith.constant 0 : i32
    return %c0_i32 : i32
  }
  func.func @transform_3(%arg0: i32) -> (i32, i32) {
    %c0_i32 = arith.constant 0 : i32
    %c0_i32_0 = arith.constant 0 : i32
    return %arg0, %c0_i32 : i32, i32
  }
}

</mosaic_0001>

<bundles_post_ra>
// kernel: tpu_custom_call.1
= control target key start
LH: loop header
LB: loop body
LE: loop exit
PB: predicated region body
PF: predicated region fallthrough
CT: control target
= control target key end

     0   :  { %s178_s0 = inlined_call_operand.vmem [shape: f32[2,128], index: 0, kind: input, shape index: {}]   ;;  %s179_s1 = inlined_call_operand.vmem [shape: f32[128,16], index: 1, kind: input, shape index: {}]   ;;  %s180_s2 = inlined_call_operand.<no memory space> [shape: f32[1], index: 2, kind: input, shape index: {}]   ;;  %s181_s3 = inlined_call_operand.hbm [shape: f32[2,16], index: 3, kind: output, shape index: {}]  }
   0x1   :  { %v32_v0 = vld [vmem:[%s179_s1 + $0x78] sm:$0xff]  ;;  %v31_v1 = vld [vmem:[%s179_s1 + $0x70] sm:$0xff]  ;;  %v30_v2 = vld [vmem:[%s179_s1 + $0x68] sm:$0xff] }
   0x2   :  { %35 = vmatpush.msra.mxu0 %v32_v0  ;;  %v29_v3 = vld [vmem:[%s179_s1 + $0x60] sm:$0xff] }
   0x4   :  { %36 = vmatpush.msra.mxu0 %v31_v1 }
   0x6   :  { %37 = vmatpush.msra.mxu0 %v30_v2 }
   0x7   :  { %9 = vsyncpa [#allocation4], 0  ;;  %v28_v4 = vld [vmem:[%s179_s1 + $0x58] sm:$0xff]  ;;  %v27_v5 = vld [vmem:[%s179_s1 + $0x50] sm:$0xff]  ;;  %v34_v17 = vstv %s180_s2  ;;  %s100_s21 = smov [#allocation3]   ;;  %s64_s25 = sshll.u32 %s181_s3, 4  ;;  %s65_s25 = int_to_ptr.hbm [resolvable:$true] %s64_s25 }
   0x8   :  { %38 = vmatpush.msra.mxu0 %v29_v3  ;;  %v26_v6 = vld [vmem:[%s179_s1 + $0x48] sm:$0xff]  ;;  %v25_v7 = vld [vmem:[%s179_s1 + $0x40] sm:$0xff]  ;;  %v24_v8 = vld [vmem:[%s179_s1 + $0x38] sm:$0xff]  ;;  %s62_s22 = sshll.u32 %s100_s21, 4  ;;  %vm55_vm0 = vcmask 123904   ;;  %s63_s22 = int_to_ptr.vmem [resolvable:$true] %s62_s22 }
   0x9   :  { %v23_v9 = vld [vmem:[%s179_s1 + $0x30] sm:$0xff]  ;;  %v22_v10 = vld [vmem:[%s179_s1 + $0x28] sm:$0xff]  ;;  %v21_v11 = vld [vmem:[%s179_s1 + $0x20] sm:$0xff] }
   0xa   :  { %39 = vmatpush.msra.mxu0 %v28_v4  ;;  %v20_v12 = vld [vmem:[%s179_s1 + $0x18] sm:$0xff]  ;;  %v19_v13 = vld [vmem:[%s179_s1 + $0x10] sm:$0xff]  ;;  %v18_v14 = vld [vmem:[%s179_s1 + $0x8] sm:$0xff] }
   0xb   :  { %v17_v15 = vld [vmem:[%s179_s1] sm:$0xff] }
   0xc   :  { %40 = vmatpush.msra.mxu0 %v27_v5  ;;  %v16_v16 = vld [vmem:[%s178_s0] sm:$0x3] }
   0xe   :  { %41 = vmatpush.msra.mxu0 %v26_v6 }
  0x10   :  { %42 = vmatpush.msra.mxu0 %v25_v7 }
  0x12   :  { %43 = vmatpush.msra.mxu0 %v24_v8 }
  0x14   :  { %44 = vmatpush.msra.mxu0 %v23_v9 }
  0x16   :  { %45 = vmatpush.msra.mxu0 %v22_v10 }
  0x18   :  { %46 = vmatpush.msra.mxu0 %v21_v11 }
  0x1a   :  { %47 = vmatpush.msra.mxu0 %v20_v12 }
  0x1c   :  { %48 = vmatpush.msra.mxu0 %v19_v13 }
  0x1e   :  { %49 = vmatpush.msra.mxu0 %v18_v14 }
  0x20   :  { %50 = vmatpush.msra.mxu0 %v17_v15 }
  0x21   :  { %51 = vmatmul.f32.vlgmr.msra.gmra.mxu0 %v16_v16 }
  0x9e   :  { %v52_v18 = vpop.f32.mrf.mxu0 }
  0x9f   :  { %v53_v19 = vadd.f32 %v52_v18, %v34_v17 }
  0xa1   :  { %56 = vst.msk [vmem:[#allocation3] sm:$0x3] %vm55_vm0, %v53_v19 }
  0xa2   :  { %67 = dma.vmem_to_hbm [thread:$0]  %s63_s22, 32, %s65_s25, [#allocation4]  }
  0xa3   :  { %98 = dma.done.wait [#allocation4], 32  }
  0xa4   :  { %99 = vsyncadd [#allocation4], 4294967264 }
  0xa5   :  { %72 = vsyncpa [#allocation4], 1 }

</bundles_post_ra>
